<compile_context>
chip_gen: v5e
topology: v5e:2x2
jax: 0.10.0
libtpu: 0.0.40
codegen_flags: <defaults>
</compile_context>

<pallas_src>
import functools

import jax
import jax.numpy as jnp
from jax.experimental import pallas as pl
from jax.experimental.pallas import tpu as pltpu

EPS = 1e-5
LANE = 128
_Y2_DTYPE = jnp.bfloat16          # intermediate (conv2 output) storage dtype


def _round_up(v, m):
    return ((v + m - 1) // m) * m


def _pick_nb(n, bytes_per_image, budget_bytes):
    """Largest divisor of n whose block fits the VMEM budget, keeping >=2 grid steps (v7x)."""
    nb = 1
    for d in range(1, n + 1):
        if n % d:
            continue
        if n >= 2 and n // d < 2:
            continue                      # keep both v7x TensorCores busy
        if d * bytes_per_image <= budget_bytes:
            nb = d
    return nb


# --------------------------------------------------------------------------- fused conv kernel

def _make_fused_conv_kernel(nb, k, w_big, l1o, lo2p, cnt_full, cnt_border, y2_dtype):
    """ReLU -> Conv(Kx1) -> Conv(1xK) -> masked BN partial stats, all on a VMEM-resident slab.

    Refs (one block of `nb` images per grid step):
      w1_ref : (K, C_mid, C_in)   resident
      w2_ref : (K, C_out, C_mid)  resident
      m_ref  : (1, lo2p)          resident 1/0 validity mask over the flat conv2 output
      x_ref  : (nb, C_in, L1)     contiguously-flattened zero-padded slab (row stride w_big)
      y2_ref : (nb, C_out, lo2p)  conv2 interior-row output (stride-1, flat, row stride w_big)
      sum_ref: (nb, C_out, 1)     per-image masked sum of y2 (f32)
      m2_ref : (nb, C_out, 1)     per-image centered sum of squares (f32, incl. zero-border term)
    """
    offs1 = [kh * w_big for kh in range(k)]
    inv_cnt = 1.0 / cnt_full

    def kernel(w1_ref, w2_ref, m_ref, x_ref, y2_ref, sum_ref, m2_ref):
        mask = m_ref[...]                                        # (1, lo2p)
        for i in range(nb):                                      # static unroll, nb is small
            x = jnp.maximum(x_ref[i], 0.0)                       # fused ReLU (pad zeros stay 0)
            # --- Conv(Kx1): taps shift by whole rows of the contiguous slab -----------------
            y1 = None
            for kh in range(k):
                win = x[:, offs1[kh]:offs1[kh] + l1o]            # (C_in, l1o) VMEM window
                part = jnp.dot(w1_ref[kh], win, preferred_element_type=jnp.float32)
                y1 = part if y1 is None else y1 + part           # (C_mid, l1o)
            # --- Conv(1xK): taps shift by single lanes; W-padding is already in the slab ----
            y2 = None
            for kw in range(k):
                win = y1[:, kw:kw + lo2p]                        # (C_mid, lo2p)
                part = jnp.dot(w2_ref[kw], win, preferred_element_type=jnp.float32)
                y2 = part if y2 is None else y2 + part           # (C_out, lo2p) f32
            y2_ref[i] = y2.astype(y2_dtype)
            # --- BN partials: numerically-stable centered per-image statistics --------------
            s = jnp.sum(y2 * mask, axis=1, keepdims=True)        # (C_out, 1) masked sum
            mu = s * inv_cnt                                     # per-image mean (incl. border 0s)
            d = (y2 - mu) * mask
            m2 = jnp.sum(d * d, axis=1, keepdims=True) + cnt_border * (mu * mu)
            sum_ref[i] = s
            m2_ref[i] = m2

    return kernel


# --------------------------------------------------------------------------- BN apply + crop

def _make_bn_crop_kernel(nb, p, ho1, ho2, wo2, w_big):
    """Per-channel affine normalize fused with the crop to the valid output region.

    Refs:
      scale_ref, shift_ref : (C_out, 1) resident
      y_ref  : (nb, C_out, lo2p)       stride-1 interior-row conv2 output (flat, row stride w_big)
      o_ref  : (nb, C_out, ho2 * wo2)  final output, flattened (reshaped to NCHW in the wrapper)
    """
    def kernel(scale_ref, shift_ref, y_ref, o_ref):
        sc = scale_ref[...]                                      # (C_out, 1)
        sh = shift_ref[...]
        y = y_ref[...].astype(jnp.float32)                       # (nb, C_out, lo2p)
        if p > 0:
            # conv2's zero H-padding rows: pre-BN value is exactly 0 -> post-BN value is `shift`
            border = jnp.broadcast_to(sh[None], (nb, sh.shape[0], p * wo2))
            o_ref[:, :, 0:p * wo2] = border
            o_ref[:, :, (p + ho1) * wo2:ho2 * wo2] = border
        for r in range(ho1):                                     # static unroll over output rows
            seg = y[:, :, r * w_big:r * w_big + wo2]             # valid columns of row r
            o_ref[:, :, (p + r) * wo2:(p + r + 1) * wo2] = seg * sc + sh

    return kernel


# --------------------------------------------------------------------------- forward

@functools.partial(jax.jit, static_argnames=("kernel_length", "stride", "padding"))
def fac_conv_forward(x, params, kernel_length, stride, padding):
    """FacConv forward.  x: (N, C_in, H, W) f32.  params: torch-layout weights + BN affine."""
    n, c_in, h, w = x.shape
    k, s, p = kernel_length, stride, padding
    w1, w2 = params["w1"], params["w2"]           # (C_mid,C_in,K,1), (C_out,C_mid,1,K)
    gamma = params["gamma"].astype(jnp.float32)
    beta = params["beta"].astype(jnp.float32)
    c_mid, c_out = w1.shape[0], w2.shape[0]

    if s != 1:
        # TODO(synk): stride > 1 (DARTS reduction cells) — strided fused Pallas path not yet done.
        return _reference_forward(x, params, k, s, p)

    # ---- geometry of the contiguous, doubly-W-padded slab ------------------------------------
    hp = h + 2 * p
    ho1 = hp - k + 1                              # conv1 valid output rows
    w_big = w + 4 * p                             # conv1 W-pad + conv2 W-pad, pre-built
    wo2 = w_big - k + 1                           # conv2 valid output cols (= final width)
    ho2 = ho1 + 2 * p                             # final height (incl. conv2 zero border rows)
    assert ho1 >= 1 and wo2 >= 1, "kernel larger than padded input"
    lo2 = ho1 * w_big                             # flat length of conv2 interior-row output
    lo2p = _round_up(lo2, LANE)
    l1o = lo2p + k - 1                            # conv1 output length needed by conv2 windows
    l1 = _round_up((k - 1) * w_big + l1o, LANE)   # slab lanes per image

    # ---- build the slab: one small fused XLA pad/reshape (only pre-pass left) ----------------
    xp = jnp.pad(x.astype(jnp.float32), ((0, 0), (0, 0), (p, p), (2 * p, 2 * p)))
    xs = jnp.pad(xp.reshape(n, c_in, hp * w_big), ((0, 0), (0, 0), (0, l1 - hp * w_big)))

    w1_t = jnp.transpose(w1[:, :, :, 0], (2, 0, 1)).astype(jnp.float32)   # (K, C_mid, C_in)
    w2_t = jnp.transpose(w2[:, :, 0, :], (2, 0, 1)).astype(jnp.float32)   # (K, C_out, C_mid)

    lane = jnp.arange(lo2p, dtype=jnp.int32)
    mask = ((lane < lo2) & ((lane % w_big) < wo2)).astype(jnp.float32).reshape(1, lo2p)

    cnt_full = float(ho2 * wo2)                   # BN count per image (incl. zero border rows)
    cnt_border = float(2 * p * wo2)               # zero border elements per image

    # ---- block sizing: batch NB images per step, VMEM limit from actual buffer sizes ---------
    per_img_bytes = 4 * (c_in * l1 + 2 * c_mid * l1o + 2 * c_out * lo2p)
    nb = _pick_nb(n, per_img_bytes, budget_bytes=8 * 2**20)
    vmem_limit = int(min(100 * 2**20, max(16 * 2**20, 6 * nb * per_img_bytes + 4 * 2**20)))

    conv_kernel = _make_fused_conv_kernel(nb, k, w_big, l1o, lo2p, cnt_full, cnt_border, _Y2_DTYPE)
    y2, psum, pm2 = pl.pallas_call(
        conv_kernel,
        out_shape=(
            jax.ShapeDtypeStruct((n, c_out, lo2p), _Y2_DTYPE),
            jax.ShapeDtypeStruct((n, c_out, 1), jnp.float32),
            jax.ShapeDtypeStruct((n, c_out, 1), jnp.float32),
        ),
        grid=(n // nb,),
        in_specs=[
            pl.BlockSpec((k, c_mid, c_in), lambda i: (0, 0, 0)),     # resident weights
            pl.BlockSpec((k, c_out, c_mid), lambda i: (0, 0, 0)),
            pl.BlockSpec((1, lo2p), lambda i: (0, 0)),               # resident validity mask
            pl.BlockSpec((nb, c_in, l1), lambda i: (i, 0, 0)),       # nb image slabs per step
        ],
        out_specs=(
            pl.BlockSpec((nb, c_out, lo2p), lambda i: (i, 0, 0)),
            pl.BlockSpec((nb, c_out, 1), lambda i: (i, 0, 0)),
            pl.BlockSpec((nb, c_out, 1), lambda i: (i, 0, 0)),
        ),
        compiler_params=pltpu.CompilerParams(
            dimension_semantics=("parallel",),
            vmem_limit_bytes=vmem_limit,
        ),
    )(w1_t, w2_t, mask, xs)

    # ---- BatchNorm2d batch stats: Chan combine of per-image centered partials (f32) ----------
    cnt_total = n * cnt_full
    s_img = psum[:, :, 0]                         # (N, C_out)
    mu_img = s_img / cnt_full
    mean = jnp.sum(s_img, axis=0) / cnt_total
    m2_tot = jnp.sum(pm2[:, :, 0], axis=0) + cnt_full * jnp.sum((mu_img - mean) ** 2, axis=0)
    var = m2_tot / cnt_total                      # biased variance (train-mode BN)
    inv_std = jax.lax.rsqrt(var + EPS)
    scale = (gamma * inv_std).reshape(c_out, 1)
    shift = (beta - mean * gamma * inv_std).reshape(c_out, 1)

    # ---- fused BN apply + crop (only the valid output region is written to HBM) --------------
    bn_kernel = _make_bn_crop_kernel(nb, p, ho1, ho2, wo2, w_big)
    out_flat = pl.pallas_call(
        bn_kernel,
        out_shape=jax.ShapeDtypeStruct((n, c_out, ho2 * wo2), jnp.float32),
        grid=(n // nb,),
        in_specs=[
            pl.BlockSpec((c_out, 1), lambda i: (0, 0)),
            pl.BlockSpec((c_out, 1), lambda i: (0, 0)),
            pl.BlockSpec((nb, c_out, lo2p), lambda i: (i, 0, 0)),
        ],
        out_specs=pl.BlockSpec((nb, c_out, ho2 * wo2), lambda i: (i, 0, 0)),
        compiler_params=pltpu.CompilerParams(
            dimension_semantics=("parallel",),
            vmem_limit_bytes=vmem_limit,
        ),
    )(scale, shift, y2)

    return out_flat.reshape(n, c_out, ho2, wo2)   # contiguous split of the minor dim (free)


# --------------------------------------------------------------------------- reference

def _reference_forward(x, params, kernel_length, stride, padding):
    """Pure-XLA reference mirroring the PyTorch module (train-mode BN)."""
    s, p = stride, padding
    hi = jax.lax.Precision.HIGHEST
    y = jnp.maximum(x, 0.0)
    y = jax.lax.conv_general_dilated(
        y, params["w1"], window_strides=(s, s), padding=((p, p), (p, p)),
        dimension_numbers=("NCHW", "OIHW", "NCHW"), precision=hi)
    y = jax.lax.conv_general_dilated(
        y, params["w2"], window_strides=(s, s), padding=((p, p), (p, p)),
        dimension_numbers=("NCHW", "OIHW", "NCHW"), precision=hi)
    mean = jnp.mean(y, axis=(0, 2, 3), keepdims=True)
    var = jnp.mean((y - mean) ** 2, axis=(0, 2, 3), keepdims=True)
    yn = (y - mean) / jnp.sqrt(var + EPS)
    return yn * params["gamma"].reshape(1, -1, 1, 1) + params["beta"].reshape(1, -1, 1, 1)


# --------------------------------------------------------------------------- main

if __name__ == "__main__":
    key = jax.random.PRNGKey(0)
    kx, k1, k2, kg, kb = jax.random.split(key, 5)

    N, C_IN, C_OUT, H, W = 2, 4, 8, 16, 16
    K, STRIDE, PAD = 3, 1, 1

    x = jax.random.normal(kx, (N, C_IN, H, W), jnp.float32)
    params = {
        "w1": 0.2 * jax.random.normal(k1, (C_IN, C_IN, K, 1), jnp.float32),   # Conv(Kx1)
        "w2": 0.2 * jax.random.normal(k2, (C_OUT, C_IN, 1, K), jnp.float32),  # Conv(1xK)
        "gamma": 1.0 + 0.1 * jax.random.normal(kg, (C_OUT,), jnp.float32),    # BN affine
        "beta": 0.1 * jax.random.normal(kb, (C_OUT,), jnp.float32),
    }

    out = fac_conv_forward(x, params, kernel_length=K, stride=STRIDE, padding=PAD)
    out = jax.block_until_ready(out)

    ho1 = (H + 2 * PAD - K) // STRIDE + 1
    wo1 = (W + 2 * PAD - 1) // STRIDE + 1
    ho2 = (ho1 + 2 * PAD - 1) // STRIDE + 1
    wo2 = (wo1 + 2 * PAD - K) // STRIDE + 1
    assert out.shape == (N, C_OUT, ho2, wo2), out.shape
    assert out.dtype == jnp.float32
    assert bool(jnp.all(jnp.isfinite(out)))

    ref = _reference_forward(x, params, K, STRIDE, PAD)
    err = float(jnp.max(jnp.abs(out - ref)))
    # BN statistics are f32 + centered (Chan) — the tolerance only covers bf16 rounding of the
    # stored y2 intermediate (a deliberate bandwidth optimization); with _Y2_DTYPE=float32 the
    # kernel matches to ~1e-4.
    tol = 3e-2 if _Y2_DTYPE == jnp.bfloat16 else 1.5e-3
    assert err < tol, f"max abs error vs XLA reference: {err}"

    print("KERNEL_OK")
</pallas_src>

<mosaic_0001>
module attributes {stable_mosaic.version = 11 : i64} {
  func.func @kernel(%arg0: i32, %arg1: memref<3x4x4xf32, #tpu.memory_space<vmem>>, %arg2: memref<3x8x4xf32, #tpu.memory_space<vmem>>, %arg3: memref<1x384xf32, #tpu.memory_space<vmem>>, %arg4: memref<1x4x512xf32, #tpu.memory_space<vmem>>, %arg5: memref<1x8x384xbf16, #tpu.memory_space<vmem>>, %arg6: memref<1x8x1xf32, #tpu.memory_space<vmem>>, %arg7: memref<1x8x1xf32, #tpu.memory_space<vmem>>) attributes {dimension_semantics = [#tpu.dimension_semantics<parallel>], iteration_bounds = array<i64: 2>, scalar_prefetch = 0 : i64, scratch_operands = 0 : i64, tpu.core_type = #tpu.core_type<tc>, window_params = [{pipeline_mode = #tpu.pipeline_mode<synchronous>, transform_indices = @transform_0, window_bounds = array<i64: 3, 4, 4>}, {pipeline_mode = #tpu.pipeline_mode<synchronous>, transform_indices = @transform_1, window_bounds = array<i64: 3, 8, 4>}, {pipeline_mode = #tpu.pipeline_mode<synchronous>, transform_indices = @transform_2, window_bounds = array<i64: 1, 384>}, {transform_indices = @transform_3, window_bounds = array<i64: 1, 4, 512>}, {transform_indices = @transform_4, window_bounds = array<i64: 1, 8, 384>}, {transform_indices = @transform_5, window_bounds = array<i64: 1, 8, 1>}, {transform_indices = @transform_6, window_bounds = array<i64: 1, 8, 1>}]} {
    %c0 = arith.constant 0 : index
    %c0_0 = arith.constant 0 : index
    %0 = vector.load %arg3[%c0, %c0_0] : memref<1x384xf32, #tpu.memory_space<vmem>>, vector<1x384xf32>
    %c0_1 = arith.constant 0 : index
    %c0_2 = arith.constant 0 : index
    %c0_3 = arith.constant 0 : index
    %1 = vector.load %arg4[%c0_1, %c0_2, %c0_3] : memref<1x4x512xf32, #tpu.memory_space<vmem>>, vector<1x4x512xf32>
    %2 = vector.shape_cast %1 : vector<1x4x512xf32> to vector<4x512xf32>
    %cst = arith.constant 0.000000e+00 : f32
    %3 = vector.broadcast %cst : f32 to vector<4x512xf32>
    %4 = arith.maximumf %2, %3 : vector<4x512xf32>
    %5 = vector.extract_strided_slice %4 {offsets = [0, 0], sizes = [4, 386], strides = [1, 1]} : vector<4x512xf32> to vector<4x386xf32>
    %c0_4 = arith.constant 0 : index
    %c0_5 = arith.constant 0 : index
    %c0_6 = arith.constant 0 : index
    %6 = vector.load %arg1[%c0_4, %c0_5, %c0_6] : memref<3x4x4xf32, #tpu.memory_space<vmem>>, vector<1x4x4xf32>
    %7 = vector.shape_cast %6 : vector<1x4x4xf32> to vector<4x4xf32>
    %cst_7 = arith.constant dense<0.000000e+00> : vector<4x386xf32>
    %8 = tpu.matmul %7, %5, %cst_7 {dimension_numbers = #tpu.dot_dimension_numbers<[1], [0], [0], [1], [0, 0, 1, 1], [], []>} : vector<4x4xf32>, vector<4x386xf32>, vector<4x386xf32> -> vector<4x386xf32>
    %9 = vector.extract_strided_slice %4 {offsets = [0, 20], sizes = [4, 386], strides = [1, 1]} : vector<4x512xf32> to vector<4x386xf32>
    %c1 = arith.constant 1 : index
    %c0_8 = arith.constant 0 : index
    %c0_9 = arith.constant 0 : index
    %10 = vector.load %arg1[%c1, %c0_8, %c0_9] : memref<3x4x4xf32, #tpu.memory_space<vmem>>, vector<1x4x4xf32>
    %11 = vector.shape_cast %10 : vector<1x4x4xf32> to vector<4x4xf32>
    %cst_10 = arith.constant dense<0.000000e+00> : vector<4x386xf32>
    %12 = tpu.matmul %11, %9, %cst_10 {dimension_numbers = #tpu.dot_dimension_numbers<[1], [0], [0], [1], [0, 0, 1, 1], [], []>} : vector<4x4xf32>, vector<4x386xf32>, vector<4x386xf32> -> vector<4x386xf32>
    %13 = arith.addf %8, %12 : vector<4x386xf32>
    %14 = vector.extract_strided_slice %4 {offsets = [0, 40], sizes = [4, 386], strides = [1, 1]} : vector<4x512xf32> to vector<4x386xf32>
    %c2 = arith.constant 2 : index
    %c0_11 = arith.constant 0 : index
    %c0_12 = arith.constant 0 : index
    %15 = vector.load %arg1[%c2, %c0_11, %c0_12] : memref<3x4x4xf32, #tpu.memory_space<vmem>>, vector<1x4x4xf32>
    %16 = vector.shape_cast %15 : vector<1x4x4xf32> to vector<4x4xf32>
    %cst_13 = arith.constant dense<0.000000e+00> : vector<4x386xf32>
    %17 = tpu.matmul %16, %14, %cst_13 {dimension_numbers = #tpu.dot_dimension_numbers<[1], [0], [0], [1], [0, 0, 1, 1], [], []>} : vector<4x4xf32>, vector<4x386xf32>, vector<4x386xf32> -> vector<4x386xf32>
    %18 = arith.addf %13, %17 : vector<4x386xf32>
    %19 = vector.extract_strided_slice %18 {offsets = [0, 0], sizes = [4, 384], strides = [1, 1]} : vector<4x386xf32> to vector<4x384xf32>
    %c0_14 = arith.constant 0 : index
    %c0_15 = arith.constant 0 : index
    %c0_16 = arith.constant 0 : index
    %20 = vector.load %arg2[%c0_14, %c0_15, %c0_16] : memref<3x8x4xf32, #tpu.memory_space<vmem>>, vector<1x8x4xf32>
    %21 = vector.shape_cast %20 : vector<1x8x4xf32> to vector<8x4xf32>
    %cst_17 = arith.constant dense<0.000000e+00> : vector<8x384xf32>
    %22 = tpu.matmul %21, %19, %cst_17 {dimension_numbers = #tpu.dot_dimension_numbers<[1], [0], [0], [1], [0, 0, 1, 1], [], []>} : vector<8x4xf32>, vector<4x384xf32>, vector<8x384xf32> -> vector<8x384xf32>
    %23 = vector.extract_strided_slice %18 {offsets = [0, 1], sizes = [4, 384], strides = [1, 1]} : vector<4x386xf32> to vector<4x384xf32>
    %c1_18 = arith.constant 1 : index
    %c0_19 = arith.constant 0 : index
    %c0_20 = arith.constant 0 : index
    %24 = vector.load %arg2[%c1_18, %c0_19, %c0_20] : memref<3x8x4xf32, #tpu.memory_space<vmem>>, vector<1x8x4xf32>
    %25 = vector.shape_cast %24 : vector<1x8x4xf32> to vector<8x4xf32>
    %cst_21 = arith.constant dense<0.000000e+00> : vector<8x384xf32>
    %26 = tpu.matmul %25, %23, %cst_21 {dimension_numbers = #tpu.dot_dimension_numbers<[1], [0], [0], [1], [0, 0, 1, 1], [], []>} : vector<8x4xf32>, vector<4x384xf32>, vector<8x384xf32> -> vector<8x384xf32>
    %27 = arith.addf %22, %26 : vector<8x384xf32>
    %28 = vector.extract_strided_slice %18 {offsets = [0, 2], sizes = [4, 384], strides = [1, 1]} : vector<4x386xf32> to vector<4x384xf32>
    %c2_22 = arith.constant 2 : index
    %c0_23 = arith.constant 0 : index
    %c0_24 = arith.constant 0 : index
    %29 = vector.load %arg2[%c2_22, %c0_23, %c0_24] : memref<3x8x4xf32, #tpu.memory_space<vmem>>, vector<1x8x4xf32>
    %30 = vector.shape_cast %29 : vector<1x8x4xf32> to vector<8x4xf32>
    %cst_25 = arith.constant dense<0.000000e+00> : vector<8x384xf32>
    %31 = tpu.matmul %30, %28, %cst_25 {dimension_numbers = #tpu.dot_dimension_numbers<[1], [0], [0], [1], [0, 0, 1, 1], [], []>} : vector<8x4xf32>, vector<4x384xf32>, vector<8x384xf32> -> vector<8x384xf32>
    %32 = arith.addf %27, %31 : vector<8x384xf32>
    %33 = arith.truncf %32 : vector<8x384xf32> to vector<8x384xbf16>
    %c0_26 = arith.constant 0 : index
    %c0_27 = arith.constant 0 : index
    %c0_28 = arith.constant 0 : index
    %34 = vector.load %arg5[%c0_26, %c0_27, %c0_28] : memref<1x8x384xbf16, #tpu.memory_space<vmem>>, vector<1x8x384xbf16>
    %35 = vector.shape_cast %34 : vector<1x8x384xbf16> to vector<8x384xbf16>
    %36 = vector.shape_cast %33 : vector<8x384xbf16> to vector<1x8x384xbf16>
    tpu.vector_store %arg5[%c0_26, %c0_27, %c0_28], %36 {strides = array<i32>} : memref<1x8x384xbf16, #tpu.memory_space<vmem>>, vector<1x8x384xbf16>,
    %37 = vector.broadcast %0 : vector<1x384xf32> to vector<8x384xf32>
    %38 = arith.mulf %32, %37 : vector<8x384xf32>
    %cst_29 = arith.constant dense<0.000000e+00> : vector<8xf32>
    %39 = vector.multi_reduction <add>, %38, %cst_29 [1] : vector<8x384xf32> to vector<8xf32>
    %40 = vector.shape_cast %39 : vector<8xf32> to vector<8x1xf32>
    %cst_30 = arith.constant 0.00308641978 : f32
    %41 = vector.broadcast %cst_30 : f32 to vector<8x1xf32>
    %42 = arith.mulf %40, %41 : vector<8x1xf32>
    %43 = vector.broadcast %42 : vector<8x1xf32> to vector<8x384xf32>
    %44 = arith.subf %32, %43 : vector<8x384xf32>
    %45 = vector.broadcast %0 : vector<1x384xf32> to vector<8x384xf32>
    %46 = arith.mulf %44, %45 : vector<8x384xf32>
    %47 = arith.mulf %46, %46 : vector<8x384xf32>
    %cst_31 = arith.constant dense<0.000000e+00> : vector<8xf32>
    %48 = vector.multi_reduction <add>, %47, %cst_31 [1] : vector<8x384xf32> to vector<8xf32>
    %49 = vector.shape_cast %48 : vector<8xf32> to vector<8x1xf32>
    %50 = arith.mulf %42, %42 : vector<8x1xf32>
    %cst_32 = arith.constant 3.600000e+01 : f32
    %51 = vector.broadcast %cst_32 : f32 to vector<8x1xf32>
    %52 = arith.mulf %51, %50 : vector<8x1xf32>
    %53 = arith.addf %49, %52 : vector<8x1xf32>
    %c0_33 = arith.constant 0 : index
    %c0_34 = arith.constant 0 : index
    %c0_35 = arith.constant 0 : index
    %54 = vector.load %arg6[%c0_33, %c0_34, %c0_35] : memref<1x8x1xf32, #tpu.memory_space<vmem>>, vector<1x8x1xf32>
    %55 = vector.shape_cast %54 : vector<1x8x1xf32> to vector<8x1xf32>
    %56 = vector.shape_cast %40 : vector<8x1xf32> to vector<1x8x1xf32>
    tpu.vector_store %arg6[%c0_33, %c0_34, %c0_35], %56 {strides = array<i32>} : memref<1x8x1xf32, #tpu.memory_space<vmem>>, vector<1x8x1xf32>,
    %c0_36 = arith.constant 0 : index
    %c0_37 = arith.constant 0 : index
    %c0_38 = arith.constant 0 : index
    %57 = vector.load %arg7[%c0_36, %c0_37, %c0_38] : memref<1x8x1xf32, #tpu.memory_space<vmem>>, vector<1x8x1xf32>
    %58 = vector.shape_cast %57 : vector<1x8x1xf32> to vector<8x1xf32>
    %59 = vector.shape_cast %53 : vector<8x1xf32> to vector<1x8x1xf32>
    tpu.vector_store %arg7[%c0_36, %c0_37, %c0_38], %59 {strides = array<i32>} : memref<1x8x1xf32, #tpu.memory_space<vmem>>, vector<1x8x1xf32>,
    return
  }
  func.func @transform_0(%arg0: i32) -> (i32, i32, i32) {
    %c0_i32 = arith.constant 0 : i32
    %c0_i32_0 = arith.constant 0 : i32
    %c0_i32_1 = arith.constant 0 : i32
    %c0_i32_2 = arith.constant 0 : i32
    return %c0_i32, %c0_i32_0, %c0_i32_1 : i32, i32, i32
  }
  func.func @transform_1(%arg0: i32) -> (i32, i32, i32) {
    %c0_i32 = arith.constant 0 : i32
    %c0_i32_0 = arith.constant 0 : i32
    %c0_i32_1 = arith.constant 0 : i32
    %c0_i32_2 = arith.constant 0 : i32
    return %c0_i32, %c0_i32_0, %c0_i32_1 : i32, i32, i32
  }
  func.func @transform_2(%arg0: i32) -> (i32, i32) {
    %c0_i32 = arith.constant 0 : i32
    %c0_i32_0 = arith.constant 0 : i32
    %c0_i32_1 = arith.constant 0 : i32
    return %c0_i32, %c0_i32_0 : i32, i32
  }
  func.func @transform_3(%arg0: i32) -> (i32, i32, i32) {
    %c0_i32 = arith.constant 0 : i32
    %c0_i32_0 = arith.constant 0 : i32
    %c0_i32_1 = arith.constant 0 : i32
    return %arg0, %c0_i32, %c0_i32_0 : i32, i32, i32
  }
  func.func @transform_4(%arg0: i32) -> (i32, i32, i32) {
    %c0_i32 = arith.constant 0 : i32
    %c0_i32_0 = arith.constant 0 : i32
    %c0_i32_1 = arith.constant 0 : i32
    return %arg0, %c0_i32, %c0_i32_0 : i32, i32, i32
  }
  func.func @transform_5(%arg0: i32) -> (i32, i32, i32) {
    %c0_i32 = arith.constant 0 : i32
    %c0_i32_0 = arith.constant 0 : i32
    %c0_i32_1 = arith.constant 0 : i32
    return %arg0, %c0_i32, %c0_i32_0 : i32, i32, i32
  }
  func.func @transform_6(%arg0: i32) -> (i32, i32, i32) {
    %c0_i32 = arith.constant 0 : i32
    %c0_i32_0 = arith.constant 0 : i32
    %c0_i32_1 = arith.constant 0 : i32
    return %arg0, %c0_i32, %c0_i32_0 : i32, i32, i32
  }
}

module attributes {stable_mosaic.version = 11 : i64} {
  func.func @kernel(%arg0: i32, %arg1: memref<8x1xf32, #tpu.memory_space<vmem>>, %arg2: memref<8x1xf32, #tpu.memory_space<vmem>>, %arg3: memref<1x8x384xbf16, #tpu.memory_space<vmem>>, %arg4: memref<1x8x324xf32, #tpu.memory_space<vmem>>) attributes {dimension_semantics = [#tpu.dimension_semantics<parallel>], iteration_bounds = array<i64: 2>, scalar_prefetch = 0 : i64, scratch_operands = 0 : i64, tpu.core_type = #tpu.core_type<tc>, window_params = [{pipeline_mode = #tpu.pipeline_mode<synchronous>, transform_indices = @transform_0, window_bounds = array<i64: 8, 1>}, {pipeline_mode = #tpu.pipeline_mode<synchronous>, transform_indices = @transform_1, window_bounds = array<i64: 8, 1>}, {transform_indices = @transform_2, window_bounds = array<i64: 1, 8, 384>}, {transform_indices = @transform_3, window_bounds = array<i64: 1, 8, 324>}]} {
    %c0 = arith.constant 0 : index
    %c0_0 = arith.constant 0 : index
    %0 = vector.load %arg1[%c0, %c0_0] : memref<8x1xf32, #tpu.memory_space<vmem>>, vector<8x1xf32>
    %c0_1 = arith.constant 0 : index
    %c0_2 = arith.constant 0 : index
    %1 = vector.load %arg2[%c0_1, %c0_2] : memref<8x1xf32, #tpu.memory_space<vmem>>, vector<8x1xf32>
    %c0_3 = arith.constant 0 : index
    %c0_4 = arith.constant 0 : index
    %c0_5 = arith.constant 0 : index
    %2 = vector.load %arg3[%c0_3, %c0_4, %c0_5] : memref<1x8x384xbf16, #tpu.memory_space<vmem>>, vector<1x8x384xbf16>
    %3 = arith.extf %2 : vector<1x8x384xbf16> to vector<1x8x384xf32>
    %4 = vector.shape_cast %1 : vector<8x1xf32> to vector<1x8x1xf32>
    %5 = vector.shape_cast %4 : vector<1x8x1xf32> to vector<1x8x1xf32>
    %6 = vector.broadcast %5 : vector<1x8x1xf32> to vector<1x8x18xf32>
    %c0_6 = arith.constant 0 : index
    %c0_7 = arith.constant 0 : index
    %c0_8 = arith.constant 0 : index
    %7 = vector.load %arg4[%c0_6, %c0_7, %c0_8] : memref<1x8x324xf32, #tpu.memory_space<vmem>>, vector<1x8x18xf32>
    tpu.vector_store %arg4[%c0_6, %c0_7, %c0_8], %6 {strides = array<i32>} : memref<1x8x324xf32, #tpu.memory_space<vmem>>, vector<1x8x18xf32>,
    %c0_9 = arith.constant 0 : index
    %c0_10 = arith.constant 0 : index
    %c306 = arith.constant 306 : index
    %8 = vector.load %arg4[%c0_9, %c0_10, %c306] : memref<1x8x324xf32, #tpu.memory_space<vmem>>, vector<1x8x18xf32>
    tpu.vector_store %arg4[%c0_9, %c0_10, %c306], %6 {strides = array<i32>} : memref<1x8x324xf32, #tpu.memory_space<vmem>>, vector<1x8x18xf32>,
    %9 = vector.extract_strided_slice %3 {offsets = [0, 0, 0], sizes = [1, 8, 18], strides = [1, 1, 1]} : vector<1x8x384xf32> to vector<1x8x18xf32>
    %10 = vector.shape_cast %0 : vector<8x1xf32> to vector<1x8x1xf32>
    %11 = vector.broadcast %10 : vector<1x8x1xf32> to vector<1x8x18xf32>
    %12 = arith.mulf %9, %11 : vector<1x8x18xf32>
    %13 = vector.shape_cast %1 : vector<8x1xf32> to vector<1x8x1xf32>
    %14 = vector.broadcast %13 : vector<1x8x1xf32> to vector<1x8x18xf32>
    %15 = arith.addf %12, %14 : vector<1x8x18xf32>
    %c0_11 = arith.constant 0 : index
    %c0_12 = arith.constant 0 : index
    %c18 = arith.constant 18 : index
    %16 = vector.load %arg4[%c0_11, %c0_12, %c18] : memref<1x8x324xf32, #tpu.memory_space<vmem>>, vector<1x8x18xf32>
    tpu.vector_store %arg4[%c0_11, %c0_12, %c18], %15 {strides = array<i32>} : memref<1x8x324xf32, #tpu.memory_space<vmem>>, vector<1x8x18xf32>,
    %17 = vector.extract_strided_slice %3 {offsets = [0, 0, 20], sizes = [1, 8, 18], strides = [1, 1, 1]} : vector<1x8x384xf32> to vector<1x8x18xf32>
    %18 = vector.shape_cast %0 : vector<8x1xf32> to vector<1x8x1xf32>
    %19 = vector.broadcast %18 : vector<1x8x1xf32> to vector<1x8x18xf32>
    %20 = arith.mulf %17, %19 : vector<1x8x18xf32>
    %21 = vector.shape_cast %1 : vector<8x1xf32> to vector<1x8x1xf32>
    %22 = vector.broadcast %21 : vector<1x8x1xf32> to vector<1x8x18xf32>
    %23 = arith.addf %20, %22 : vector<1x8x18xf32>
    %c0_13 = arith.constant 0 : index
    %c0_14 = arith.constant 0 : index
    %c36 = arith.constant 36 : index
    %24 = vector.load %arg4[%c0_13, %c0_14, %c36] : memref<1x8x324xf32, #tpu.memory_space<vmem>>, vector<1x8x18xf32>
    tpu.vector_store %arg4[%c0_13, %c0_14, %c36], %23 {strides = array<i32>} : memref<1x8x324xf32, #tpu.memory_space<vmem>>, vector<1x8x18xf32>,
    %25 = vector.extract_strided_slice %3 {offsets = [0, 0, 40], sizes = [1, 8, 18], strides = [1, 1, 1]} : vector<1x8x384xf32> to vector<1x8x18xf32>
    %26 = vector.shape_cast %0 : vector<8x1xf32> to vector<1x8x1xf32>
    %27 = vector.broadcast %26 : vector<1x8x1xf32> to vector<1x8x18xf32>
    %28 = arith.mulf %25, %27 : vector<1x8x18xf32>
    %29 = vector.shape_cast %1 : vector<8x1xf32> to vector<1x8x1xf32>
    %30 = vector.broadcast %29 : vector<1x8x1xf32> to vector<1x8x18xf32>
    %31 = arith.addf %28, %30 : vector<1x8x18xf32>
    %c0_15 = arith.constant 0 : index
    %c0_16 = arith.constant 0 : index
    %c54 = arith.constant 54 : index
    %32 = vector.load %arg4[%c0_15, %c0_16, %c54] : memref<1x8x324xf32, #tpu.memory_space<vmem>>, vector<1x8x18xf32>
    tpu.vector_store %arg4[%c0_15, %c0_16, %c54], %31 {strides = array<i32>} : memref<1x8x324xf32, #tpu.memory_space<vmem>>, vector<1x8x18xf32>,
    %33 = vector.extract_strided_slice %3 {offsets = [0, 0, 60], sizes = [1, 8, 18], strides = [1, 1, 1]} : vector<1x8x384xf32> to vector<1x8x18xf32>
    %34 = vector.shape_cast %0 : vector<8x1xf32> to vector<1x8x1xf32>
    %35 = vector.broadcast %34 : vector<1x8x1xf32> to vector<1x8x18xf32>
    %36 = arith.mulf %33, %35 : vector<1x8x18xf32>
    %37 = vector.shape_cast %1 : vector<8x1xf32> to vector<1x8x1xf32>
    %38 = vector.broadcast %37 : vector<1x8x1xf32> to vector<1x8x18xf32>
    %39 = arith.addf %36, %38 : vector<1x8x18xf32>
    %c0_17 = arith.constant 0 : index
    %c0_18 = arith.constant 0 : index
    %c72 = arith.constant 72 : index
    %40 = vector.load %arg4[%c0_17, %c0_18, %c72] : memref<1x8x324xf32, #tpu.memory_space<vmem>>, vector<1x8x18xf32>
    tpu.vector_store %arg4[%c0_17, %c0_18, %c72], %39 {strides = array<i32>} : memref<1x8x324xf32, #tpu.memory_space<vmem>>, vector<1x8x18xf32>,
    %41 = vector.extract_strided_slice %3 {offsets = [0, 0, 80], sizes = [1, 8, 18], strides = [1, 1, 1]} : vector<1x8x384xf32> to vector<1x8x18xf32>
    %42 = vector.shape_cast %0 : vector<8x1xf32> to vector<1x8x1xf32>
    %43 = vector.broadcast %42 : vector<1x8x1xf32> to vector<1x8x18xf32>
    %44 = arith.mulf %41, %43 : vector<1x8x18xf32>
    %45 = vector.shape_cast %1 : vector<8x1xf32> to vector<1x8x1xf32>
    %46 = vector.broadcast %45 : vector<1x8x1xf32> to vector<1x8x18xf32>
    %47 = arith.addf %44, %46 : vector<1x8x18xf32>
    %c0_19 = arith.constant 0 : index
    %c0_20 = arith.constant 0 : index
    %c90 = arith.constant 90 : index
    %48 = vector.load %arg4[%c0_19, %c0_20, %c90] : memref<1x8x324xf32, #tpu.memory_space<vmem>>, vector<1x8x18xf32>
    tpu.vector_store %arg4[%c0_19, %c0_20, %c90], %47 {strides = array<i32>} : memref<1x8x324xf32, #tpu.memory_space<vmem>>, vector<1x8x18xf32>,
    %49 = vector.extract_strided_slice %3 {offsets = [0, 0, 100], sizes = [1, 8, 18], strides = [1, 1, 1]} : vector<1x8x384xf32> to vector<1x8x18xf32>
    %50 = vector.shape_cast %0 : vector<8x1xf32> to vector<1x8x1xf32>
    %51 = vector.broadcast %50 : vector<1x8x1xf32> to vector<1x8x18xf32>
    %52 = arith.mulf %49, %51 : vector<1x8x18xf32>
    %53 = vector.shape_cast %1 : vector<8x1xf32> to vector<1x8x1xf32>
    %54 = vector.broadcast %53 : vector<1x8x1xf32> to vector<1x8x18xf32>
    %55 = arith.addf %52, %54 : vector<1x8x18xf32>
    %c0_21 = arith.constant 0 : index
    %c0_22 = arith.constant 0 : index
    %c108 = arith.constant 108 : index
    %56 = vector.load %arg4[%c0_21, %c0_22, %c108] : memref<1x8x324xf32, #tpu.memory_space<vmem>>, vector<1x8x18xf32>
    tpu.vector_store %arg4[%c0_21, %c0_22, %c108], %55 {strides = array<i32>} : memref<1x8x324xf32, #tpu.memory_space<vmem>>, vector<1x8x18xf32>,
    %57 = vector.extract_strided_slice %3 {offsets = [0, 0, 120], sizes = [1, 8, 18], strides = [1, 1, 1]} : vector<1x8x384xf32> to vector<1x8x18xf32>
    %58 = vector.shape_cast %0 : vector<8x1xf32> to vector<1x8x1xf32>
    %59 = vector.broadcast %58 : vector<1x8x1xf32> to vector<1x8x18xf32>
    %60 = arith.mulf %57, %59 : vector<1x8x18xf32>
    %61 = vector.shape_cast %1 : vector<8x1xf32> to vector<1x8x1xf32>
    %62 = vector.broadcast %61 : vector<1x8x1xf32> to vector<1x8x18xf32>
    %63 = arith.addf %60, %62 : vector<1x8x18xf32>
    %c0_23 = arith.constant 0 : index
    %c0_24 = arith.constant 0 : index
    %c126 = arith.constant 126 : index
    %64 = vector.load %arg4[%c0_23, %c0_24, %c126] : memref<1x8x324xf32, #tpu.memory_space<vmem>>, vector<1x8x18xf32>
    tpu.vector_store %arg4[%c0_23, %c0_24, %c126], %63 {strides = array<i32>} : memref<1x8x324xf32, #tpu.memory_space<vmem>>, vector<1x8x18xf32>,
    %65 = vector.extract_strided_slice %3 {offsets = [0, 0, 140], sizes = [1, 8, 18], strides = [1, 1, 1]} : vector<1x8x384xf32> to vector<1x8x18xf32>
    %66 = vector.shape_cast %0 : vector<8x1xf32> to vector<1x8x1xf32>
    %67 = vector.broadcast %66 : vector<1x8x1xf32> to vector<1x8x18xf32>
    %68 = arith.mulf %65, %67 : vector<1x8x18xf32>
    %69 = vector.shape_cast %1 : vector<8x1xf32> to vector<1x8x1xf32>
    %70 = vector.broadcast %69 : vector<1x8x1xf32> to vector<1x8x18xf32>
    %71 = arith.addf %68, %70 : vector<1x8x18xf32>
    %c0_25 = arith.constant 0 : index
    %c0_26 = arith.constant 0 : index
    %c144 = arith.constant 144 : index
    %72 = vector.load %arg4[%c0_25, %c0_26, %c144] : memref<1x8x324xf32, #tpu.memory_space<vmem>>, vector<1x8x18xf32>
    tpu.vector_store %arg4[%c0_25, %c0_26, %c144], %71 {strides = array<i32>} : memref<1x8x324xf32, #tpu.memory_space<vmem>>, vector<1x8x18xf32>,
    %73 = vector.extract_strided_slice %3 {offsets = [0, 0, 160], sizes = [1, 8, 18], strides = [1, 1, 1]} : vector<1x8x384xf32> to vector<1x8x18xf32>
    %74 = vector.shape_cast %0 : vector<8x1xf32> to vector<1x8x1xf32>
    %75 = vector.broadcast %74 : vector<1x8x1xf32> to vector<1x8x18xf32>
    %76 = arith.mulf %73, %75 : vector<1x8x18xf32>
    %77 = vector.shape_cast %1 : vector<8x1xf32> to vector<1x8x1xf32>
    %78 = vector.broadcast %77 : vector<1x8x1xf32> to vector<1x8x18xf32>
    %79 = arith.addf %76, %78 : vector<1x8x18xf32>
    %c0_27 = arith.constant 0 : index
    %c0_28 = arith.constant 0 : index
    %c162 = arith.constant 162 : index
    %80 = vector.load %arg4[%c0_27, %c0_28, %c162] : memref<1x8x324xf32, #tpu.memory_space<vmem>>, vector<1x8x18xf32>
    tpu.vector_store %arg4[%c0_27, %c0_28, %c162], %79 {strides = array<i32>} : memref<1x8x324xf32, #tpu.memory_space<vmem>>, vector<1x8x18xf32>,
    %81 = vector.extract_strided_slice %3 {offsets = [0, 0, 180], sizes = [1, 8, 18], strides = [1, 1, 1]} : vector<1x8x384xf32> to vector<1x8x18xf32>
    %82 = vector.shape_cast %0 : vector<8x1xf32> to vector<1x8x1xf32>
    %83 = vector.broadcast %82 : vector<1x8x1xf32> to vector<1x8x18xf32>
    %84 = arith.mulf %81, %83 : vector<1x8x18xf32>
    %85 = vector.shape_cast %1 : vector<8x1xf32> to vector<1x8x1xf32>
    %86 = vector.broadcast %85 : vector<1x8x1xf32> to vector<1x8x18xf32>
    %87 = arith.addf %84, %86 : vector<1x8x18xf32>
    %c0_29 = arith.constant 0 : index
    %c0_30 = arith.constant 0 : index
    %c180 = arith.constant 180 : index
    %88 = vector.load %arg4[%c0_29, %c0_30, %c180] : memref<1x8x324xf32, #tpu.memory_space<vmem>>, vector<1x8x18xf32>
    tpu.vector_store %arg4[%c0_29, %c0_30, %c180], %87 {strides = array<i32>} : memref<1x8x324xf32, #tpu.memory_space<vmem>>, vector<1x8x18xf32>,
    %89 = vector.extract_strided_slice %3 {offsets = [0, 0, 200], sizes = [1, 8, 18], strides = [1, 1, 1]} : vector<1x8x384xf32> to vector<1x8x18xf32>
    %90 = vector.shape_cast %0 : vector<8x1xf32> to vector<1x8x1xf32>
    %91 = vector.broadcast %90 : vector<1x8x1xf32> to vector<1x8x18xf32>
    %92 = arith.mulf %89, %91 : vector<1x8x18xf32>
    %93 = vector.shape_cast %1 : vector<8x1xf32> to vector<1x8x1xf32>
    %94 = vector.broadcast %93 : vector<1x8x1xf32> to vector<1x8x18xf32>
    %95 = arith.addf %92, %94 : vector<1x8x18xf32>
    %c0_31 = arith.constant 0 : index
    %c0_32 = arith.constant 0 : index
    %c198 = arith.constant 198 : index
    %96 = vector.load %arg4[%c0_31, %c0_32, %c198] : memref<1x8x324xf32, #tpu.memory_space<vmem>>, vector<1x8x18xf32>
    tpu.vector_store %arg4[%c0_31, %c0_32, %c198], %95 {strides = array<i32>} : memref<1x8x324xf32, #tpu.memory_space<vmem>>, vector<1x8x18xf32>,
    %97 = vector.extract_strided_slice %3 {offsets = [0, 0, 220], sizes = [1, 8, 18], strides = [1, 1, 1]} : vector<1x8x384xf32> to vector<1x8x18xf32>
    %98 = vector.shape_cast %0 : vector<8x1xf32> to vector<1x8x1xf32>
    %99 = vector.broadcast %98 : vector<1x8x1xf32> to vector<1x8x18xf32>
    %100 = arith.mulf %97, %99 : vector<1x8x18xf32>
    %101 = vector.shape_cast %1 : vector<8x1xf32> to vector<1x8x1xf32>
    %102 = vector.broadcast %101 : vector<1x8x1xf32> to vector<1x8x18xf32>
    %103 = arith.addf %100, %102 : vector<1x8x18xf32>
    %c0_33 = arith.constant 0 : index
    %c0_34 = arith.constant 0 : index
    %c216 = arith.constant 216 : index
    %104 = vector.load %arg4[%c0_33, %c0_34, %c216] : memref<1x8x324xf32, #tpu.memory_space<vmem>>, vector<1x8x18xf32>
    tpu.vector_store %arg4[%c0_33, %c0_34, %c216], %103 {strides = array<i32>} : memref<1x8x324xf32, #tpu.memory_space<vmem>>, vector<1x8x18xf32>,
    %105 = vector.extract_strided_slice %3 {offsets = [0, 0, 240], sizes = [1, 8, 18], strides = [1, 1, 1]} : vector<1x8x384xf32> to vector<1x8x18xf32>
    %106 = vector.shape_cast %0 : vector<8x1xf32> to vector<1x8x1xf32>
    %107 = vector.broadcast %106 : vector<1x8x1xf32> to vector<1x8x18xf32>
    %108 = arith.mulf %105, %107 : vector<1x8x18xf32>
    %109 = vector.shape_cast %1 : vector<8x1xf32> to vector<1x8x1xf32>
    %110 = vector.broadcast %109 : vector<1x8x1xf32> to vector<1x8x18xf32>
    %111 = arith.addf %108, %110 : vector<1x8x18xf32>
    %c0_35 = arith.constant 0 : index
    %c0_36 = arith.constant 0 : index
    %c234 = arith.constant 234 : index
    %112 = vector.load %arg4[%c0_35, %c0_36, %c234] : memref<1x8x324xf32, #tpu.memory_space<vmem>>, vector<1x8x18xf32>
    tpu.vector_store %arg4[%c0_35, %c0_36, %c234], %111 {strides = array<i32>} : memref<1x8x324xf32, #tpu.memory_space<vmem>>, vector<1x8x18xf32>,
    %113 = vector.extract_strided_slice %3 {offsets = [0, 0, 260], sizes = [1, 8, 18], strides = [1, 1, 1]} : vector<1x8x384xf32> to vector<1x8x18xf32>
    %114 = vector.shape_cast %0 : vector<8x1xf32> to vector<1x8x1xf32>
    %115 = vector.broadcast %114 : vector<1x8x1xf32> to vector<1x8x18xf32>
    %116 = arith.mulf %113, %115 : vector<1x8x18xf32>
    %117 = vector.shape_cast %1 : vector<8x1xf32> to vector<1x8x1xf32>
    %118 = vector.broadcast %117 : vector<1x8x1xf32> to vector<1x8x18xf32>
    %119 = arith.addf %116, %118 : vector<1x8x18xf32>
    %c0_37 = arith.constant 0 : index
    %c0_38 = arith.constant 0 : index
    %c252 = arith.constant 252 : index
    %120 = vector.load %arg4[%c0_37, %c0_38, %c252] : memref<1x8x324xf32, #tpu.memory_space<vmem>>, vector<1x8x18xf32>
    tpu.vector_store %arg4[%c0_37, %c0_38, %c252], %119 {strides = array<i32>} : memref<1x8x324xf32, #tpu.memory_space<vmem>>, vector<1x8x18xf32>,
    %121 = vector.extract_strided_slice %3 {offsets = [0, 0, 280], sizes = [1, 8, 18], strides = [1, 1, 1]} : vector<1x8x384xf32> to vector<1x8x18xf32>
    %122 = vector.shape_cast %0 : vector<8x1xf32> to vector<1x8x1xf32>
    %123 = vector.broadcast %122 : vector<1x8x1xf32> to vector<1x8x18xf32>
    %124 = arith.mulf %121, %123 : vector<1x8x18xf32>
    %125 = vector.shape_cast %1 : vector<8x1xf32> to vector<1x8x1xf32>
    %126 = vector.broadcast %125 : vector<1x8x1xf32> to vector<1x8x18xf32>
    %127 = arith.addf %124, %126 : vector<1x8x18xf32>
    %c0_39 = arith.constant 0 : index
    %c0_40 = arith.constant 0 : index
    %c270 = arith.constant 270 : index
    %128 = vector.load %arg4[%c0_39, %c0_40, %c270] : memref<1x8x324xf32, #tpu.memory_space<vmem>>, vector<1x8x18xf32>
    tpu.vector_store %arg4[%c0_39, %c0_40, %c270], %127 {strides = array<i32>} : memref<1x8x324xf32, #tpu.memory_space<vmem>>, vector<1x8x18xf32>,
    %129 = vector.extract_strided_slice %3 {offsets = [0, 0, 300], sizes = [1, 8, 18], strides = [1, 1, 1]} : vector<1x8x384xf32> to vector<1x8x18xf32>
    %130 = vector.shape_cast %0 : vector<8x1xf32> to vector<1x8x1xf32>
    %131 = vector.broadcast %130 : vector<1x8x1xf32> to vector<1x8x18xf32>
    %132 = arith.mulf %129, %131 : vector<1x8x18xf32>
    %133 = vector.shape_cast %1 : vector<8x1xf32> to vector<1x8x1xf32>
    %134 = vector.broadcast %133 : vector<1x8x1xf32> to vector<1x8x18xf32>
    %135 = arith.addf %132, %134 : vector<1x8x18xf32>
    %c0_41 = arith.constant 0 : index
    %c0_42 = arith.constant 0 : index
    %c288 = arith.constant 288 : index
    %136 = vector.load %arg4[%c0_41, %c0_42, %c288] : memref<1x8x324xf32, #tpu.memory_space<vmem>>, vector<1x8x18xf32>
    tpu.vector_store %arg4[%c0_41, %c0_42, %c288], %135 {strides = array<i32>} : memref<1x8x324xf32, #tpu.memory_space<vmem>>, vector<1x8x18xf32>,
    return
  }
  func.func @transform_0(%arg0: i32) -> (i32, i32) {
    %c0_i32 = arith.constant 0 : i32
    %c0_i32_0 = arith.constant 0 : i32
    %c0_i32_1 = arith.constant 0 : i32
    return %c0_i32, %c0_i32_0 : i32, i32
  }
  func.func @transform_1(%arg0: i32) -> (i32, i32) {
    %c0_i32 = arith.constant 0 : i32
    %c0_i32_0 = arith.constant 0 : i32
    %c0_i32_1 = arith.constant 0 : i32
    return %c0_i32, %c0_i32_0 : i32, i32
  }
  func.func @transform_2(%arg0: i32) -> (i32, i32, i32) {
    %c0_i32 = arith.constant 0 : i32
    %c0_i32_0 = arith.constant 0 : i32
    %c0_i32_1 = arith.constant 0 : i32
    return %arg0, %c0_i32, %c0_i32_0 : i32, i32, i32
  }
  func.func @transform_3(%arg0: i32) -> (i32, i32, i32) {
    %c0_i32 = arith.constant 0 : i32
    %c0_i32_0 = arith.constant 0 : i32
    %c0_i32_1 = arith.constant 0 : i32
    return %arg0, %c0_i32, %c0_i32_0 : i32, i32, i32
  }
}

</mosaic_0001>

<bundles_post_ra>
// kernel: fac_conv_forward.3
= control target key start
LH: loop header
LB: loop body
LE: loop exit
PB: predicated region body
PF: predicated region fallthrough
CT: control target
= control target key end

     0   :  { %s426_s12 = smov 0   ;;  %s480_s0 = inlined_call_operand.vmem [shape: f32[8,1], index: 0, kind: input, shape index: {}]   ;;  %s481_s1 = inlined_call_operand.vmem [shape: f32[8,1], index: 1, kind: input, shape index: {}]   ;;  %s482_s2 = inlined_call_operand.vmem [shape: bf16[2,8,384], index: 2, kind: input, shape index: {}]   ;;  %s483_s3 = inlined_call_operand.vmem [shape: f32[2,8,324], index: 3, kind: output, shape index: {}]  }
   0x1 LB: > { %s346_s13 = sadd.s32 4294967295, %s388_s12   ;;  %p350_p0 = scmp.ge.s32.totalorder %s388_s12, 1  ;;  %s388_s12 = sphi %s426_s12, %s13_s12  }
   0x2   : > { %p137_p1 = scmp.lt.s32.totalorder %s388_s12, 3 }
   0x4   : > { %p138_p2 = pnand %p350_p0, %p137_p1 }
   0x5   : > { %p161_p3 = scmp.lt.s32.totalorder (!%p138_p2), %s346_s13, 1  ;;  %s391_s26 = smov (!%p138_p2), 4  }
   0x6   : > { %141 = sbr.rel (%p138_p2) target bundleno = 296 (0x128), region = 32  ;;  %s392_s27 = smov (!%p138_p2), 6  }
   0x7   : > { %s393_s28 = smov (!%p138_p2), 18   ;;  %s394_s29 = smov (!%p138_p2), 12  }
   0x8   : > { %s395_s30 = smov (!%p138_p2), 16   ;;  %s396_s4 = smov (!%p138_p2), 124  }
   0x9   : > { %s397_s5 = smov (!%p138_p2), 14   ;;  %s398_s6 = smov (!%p138_p2), 2  }
   0xa   : > { %s399_s7 = smov (!%p138_p2), 120   ;;  %s400_s8 = smov (!%p138_p2), 10  }
   0xb   : > { %v171_v0 = vld [vmem:[%s480_s0] sm:$0xff]  ;;  %v390_v1 = vmov 0   ;;  %s485_s13 = smov (!%p161_p3, %s346_s13), 1  ;;  %vm183_vm0 = vcmask 146432   ;;  %vm185_vm1 = vcmask 556432   ;;  %s401_s9 = smov 126  }
   0xc   : > { %381 = vset.pattern.permute.xlu0 %v390_v1  ;;  %v172_v2 = vld [vmem:[%s481_s1] sm:$0xff]  ;;  %s355_s18 = smul.u32 12, %s485_s13  ;;  %s402_s10 = smov 116   ;;  %vm232_vm2 = vcmask 48128   ;;  %vm238_vm3 = vcmask 130048   ;;  %vm243_vm4 = vcmask 277632  }
   0xd   : > { %189 = vperm.xlu0 %381, %v171_v0   ;;  %s356_s22 = smul.u32 24, %s485_s13  ;;  %s403_s11 = smov 122   ;;  %vm198_vm5 = vcmask 294032   ;;  %vm203_vm6 = vcmask 441632   ;;  %vm208_vm7 = vcmask 589232   ;;  %vm213_vm8 = vcmask 736832  }
   0xe   : > { %s165_s21 = scalar_lea.vmem %s482_s2, %s355_s18  ;;  %s404_s13 = smov 118   ;;  %vm218_vm9 = vcmask 884432   ;;  %vm248_vm10 = vcmask 425232   ;;  %vm250_vm11 = vcmask 572832   ;;  %vm279_vm12 = vcmask 113664  }
   0xf   : > { %v173_v4 = vld [vmem:[%s165_s21] sm:$0xff]  ;;  %s446_s25 = scalar_lea.vmem %s483_s3, %s356_s22  ;;  %v174_v12 = vld [vmem:[%s165_s21 + $0x8] sm:$0xf]  ;;  %s405_s14 = smov 8   ;;  %vm255_vm13 = vcmask 720432   ;;  %vm260_vm14 = vcmask 868032  }
  0x10   : > { %v175_v5 = vunpack.c.l.bf16 %v173_v4  ;;  %v176_v6 = vunpack.c.h.bf16 %v173_v4  ;;  %v177_v13 = vunpack.c.l.bf16 %v174_v12  ;;  %vm284_vm15 = vcmask 261232  }
  0x15   : > { %180 = vperm.xlu0 %381, %v172_v2  }
  0x7f   : > { %v190_v3 = vpop.permute.xlu0 %189 }
  0x80   : > { %v192_v7 = vmul.f32 %v190_v3, %v175_v5  ;;  %v225_v8 = vmul.f32 %v190_v3, %v176_v6  ;;  %v262_v14 = vmul.f32 %v190_v3, %v177_v13 }
  0x87   : > { %v181_v9 = vpop.permute.xlu0 %180 }
  0x88   : > { %v193_v10 = vadd.f32 %v192_v7, %v181_v9  ;;  %v448_v11 = vadd.f32 %v225_v8, %v181_v9  ;;  %184 = vst.msk [vmem:[%s446_s25] sm:$0xff] %vm183_vm0, %v181_v9  ;;  %v263_v15 = vadd.f32 %v262_v14, %v181_v9  ;;  %vm289_vm0 = vcmask 408832  }
  0x89   : > { %186 = vst.msk [vmem:[%s446_s25 + $0x10] sm:$0xff] %vm185_vm1, %v181_v9  ;;  %vm269_vm1 = vcmask 998400  }
  0x8a   : > { %240 = vrot.lane.b32.xlu0 %v448_v11, %s391_s26  ;;  %228 = vrot.lane.b32.xlu2 %v193_v10, %s392_s27 }
  0x8b   : > { %195 = vrot.lane.b32.xlu1 %v193_v10, %s393_s28 }
  0x92   : > { %210 = vrot.lane.b32.xlu0 %v193_v10, %s394_s29  ;;  %230 = vrot.lane.b32.xlu2 %v448_v11, %s392_s27 }
  0x93   : > { %200 = vrot.lane.b32.xlu1 %v193_v10, %s395_s30 }
  0x9a   : > { %257 = vrot.lane.b32.xlu0 %v448_v11, %s396_s4  ;;  %205 = vrot.lane.b32.xlu2 %v193_v10, %s397_s5 }
  0x9b   : > { %245 = vrot.lane.b32.xlu1 %v448_v11, %s398_s6 }
  0xa2   : > { %274 = vrot.lane.b32.xlu0 %v263_v15, %s399_s7  ;;  %215 = vrot.lane.b32.xlu2 %v193_v10, %s400_s8 }
  0xa3   : > { %252 = vrot.lane.b32.xlu1 %v448_v11, %s401_s9 }
  0xaa   : > { %286 = vrot.lane.b32.xlu0 %v263_v15, %s402_s10  ;;  %267 = vrot.lane.b32.xlu2 %v263_v15, %s403_s11 }
  0xab   : > { %265 = vrot.lane.b32.xlu1 %v448_v11, %s403_s11 }
  0xb2   : > { %281 = vrot.lane.b32.xlu2 %v263_v15, %s404_s13 }
  0xb3   : > { %220 = vrot.lane.b32.xlu1 %v193_v10, %s405_s14 }
  0xe4   : > { %v229_v16 = vpop.permute.xlu2 %228 }
  0xec   : > { %v231_v17 = vpop.permute.xlu2 %230 }
  0xed   : > { %v233_v18 = vsel %vm232_vm2, %v229_v16, %v231_v17  ;;  %vm272_vm2 = vcmask 1015632  }
  0xee   : > { %239 = vst.msk [vmem:[%s446_s25 + $0x8] sm:$0xff] %vm238_vm3, %v233_v18  ;;  %vm277_vm3 = vcmask 1048544  }
  0xf4   : > { %v206_v19 = vpop.permute.xlu2 %205 }
  0xfc   : > { %v241_v20 = vpop.permute.xlu0 %240  ;;  %v216_v22 = vpop.permute.xlu2 %215 }
  0xfd   : > { %244 = vst.msk [vmem:[%s446_s25 + $0x8] sm:$0xff] %vm243_vm4, %v241_v20  ;;  %v196_v21 = vpop.permute.xlu1 %195  ;;  %vm223_vm4 = vcmask 1032032  }
  0xfe   : > { %199 = vst.msk [vmem:[%s446_s25] sm:$0xff] %vm198_vm5, %v196_v21  ;;  %vm236_vm5 = vcmask 1048560  }
 0x104   : > { %v211_v23 = vpop.permute.xlu0 %210  ;;  %v268_v26 = vpop.permute.xlu2 %267 }
 0x105   : > { %v201_v24 = vpop.permute.xlu1 %200 }
 0x106   : > { %204 = vst.msk [vmem:[%s446_s25] sm:$0xff] %vm203_vm6, %v201_v24 }
 0x107   : > { %209 = vst.msk [vmem:[%s446_s25] sm:$0xff] %vm208_vm7, %v206_v19 }
 0x108   : > { %214 = vst.msk [vmem:[%s446_s25] sm:$0xff] %vm213_vm8, %v211_v23 }
 0x109   : > { %219 = vst.msk [vmem:[%s446_s25] sm:$0xff] %vm218_vm9, %v216_v22 }
 0x10c   : > { %v258_v25 = vpop.permute.xlu0 %257  ;;  %v282_v30 = vpop.permute.xlu2 %281 }
 0x10d   : > { %v246_v27 = vpop.permute.xlu1 %245 }
 0x10e   : > { %249 = vst.msk [vmem:[%s446_s25 + $0x8] sm:$0xff] %vm248_vm10, %v246_v27 }
 0x10f   : > { %251 = vst.msk [vmem:[%s446_s25 + $0x8] sm:$0xff] %vm250_vm11, %v448_v11 }
 0x114   : > { %v275_v28 = vpop.permute.xlu0 %274 }
 0x115   : > { %280 = vst.msk [vmem:[%s446_s25 + $0x10] sm:$0xff] %vm279_vm12, %v275_v28  ;;  %v253_v29 = vpop.permute.xlu1 %252 }
 0x116   : > { %256 = vst.msk [vmem:[%s446_s25 + $0x8] sm:$0xff] %vm255_vm13, %v253_v29 }
 0x117   : > { %261 = vst.msk [vmem:[%s446_s25 + $0x8] sm:$0xff] %vm260_vm14, %v258_v25 }
 0x118   : > { %285 = vst.msk [vmem:[%s446_s25 + $0x10] sm:$0xff] %vm284_vm15, %v282_v30 }
 0x11c   : > { %v287_v31 = vpop.permute.xlu0 %286 }
 0x11d   : > { %290 = vst.msk [vmem:[%s446_s25 + $0x10] sm:$0xff] %vm289_vm0, %v287_v31  ;;  %v266_v32 = vpop.permute.xlu1 %265 }
 0x11e   : > { %v270_v33 = vsel %vm269_vm1, %v266_v32, %v268_v26 }
 0x11f   : > { %273 = vst.msk [vmem:[%s446_s25 + $0x8] sm:$0xff] %vm272_vm2, %v270_v33 }
 0x120   : > { %278 = vst.msk [vmem:[%s446_s25 + $0x8] sm:$0xff] %vm277_vm3, %v275_v28 }
 0x125   : > { %v221_v34 = vpop.permute.xlu1 %220 }
 0x126   : > { %224 = vst.msk [vmem:[%s446_s25] sm:$0xff] %vm223_vm4, %v221_v34 }
 0x127   : > { %237 = vst.msk [vmem:[%s446_s25] sm:$0xff] %vm236_vm5, %v229_v16 }
 0x128 PF: > { %s13_s12 = sadd.s32 1, %s388_s12  }
 0x129   : > { %p10_p4 = scmp.ge.s32.totalorder %s13_s12, 4  }
 0x12b   :  { %12 = sbr.rel (!%p10_p4) target bundleno = 1 (0x1), region = 62 }

// kernel: fac_conv_forward.2
= control target key start
LH: loop header
LB: loop body
LE: loop exit
PB: predicated region body
PF: predicated region fallthrough
CT: control target
= control target key end

     0   :  { %s1126_s21 = smov 0   ;;  %s1222_s0 = inlined_call_operand.vmem [shape: f32[3,4,4], index: 0, kind: input, shape index: {}]   ;;  %s1223_s1 = inlined_call_operand.vmem [shape: f32[3,8,4], index: 1, kind: input, shape index: {}]   ;;  %s1224_s2 = inlined_call_operand.vmem [shape: f32[1,384], index: 2, kind: input, shape index: {}]   ;;  %s1225_s3 = inlined_call_operand.vmem [shape: f32[2,4,512], index: 3, kind: input, shape index: {}]   ;;  %s1226_s4 = inlined_call_operand.vmem [shape: bf16[2,8,384], index: 4, kind: output, shape index: {0}]   ;;  %s1227_s5 = inlined_call_operand.vmem [shape: f32[2,8,1], index: 5, kind: output, shape index: {1}]   ;;  %s1228_s6 = inlined_call_operand.vmem [shape: f32[2,8,1], index: 6, kind: output, shape index: {2}]  }
   0x1 LB: > { %s1007_s22 = sadd.s32 4294967295, %s1085_s21   ;;  %p1011_p0 = scmp.ge.s32.totalorder %s1085_s21, 1  ;;  %s1085_s21 = sphi %s1126_s21, %s17_s21  }
   0x2   : > { %p217_p1 = scmp.lt.s32.totalorder %s1085_s21, 3 }
   0x4   : > { %p218_p2 = pnand %p1011_p0, %p217_p1 }
   0x5   : > { %p255_p3 = scmp.lt.s32.totalorder (!%p218_p2), %s1007_s22, 1  ;;  %s1087_s27 = smov (!%p218_p2), 108  }
   0x6   : > { %221 = sbr.rel (%p218_p2) target bundleno = 814 (0x32e), region = 36  ;;  %s1088_s28 = smov (!%p218_p2), 88  }
   0x7   : > { %s1089_s11 = smov (!%p218_p2), 127   ;;  %s1090_s12 = smov (!%p218_p2), 126  }
   0xb   : > { %s1230_s22 = smov (!%p255_p3, %s1007_s22), 1  ;;  %vm306_vm0 = vcmask 1043456   ;;  %vm298_vm1 = vcmask 883712   ;;  %v1017_v22 = vld [vmem:[%s1222_s0 + $0x4] sm:$0xf]  ;;  %vm302_vm2 = vcmask 31744  }
   0xc   : > { %s1065_s23 = sshll.u32 %s1230_s22, 4  ;;  %vm510_vm3 = vcmask 719872   ;;  %v278_v27 = vld [vmem:[%s1222_s0] sm:$0xf]  ;;  %v1034_v32 = vld [vmem:[%s1222_s0 + $0x8] sm:$0xf] }
   0xd   : > { %s259_s26 = scalar_lea.vmem %s1225_s3, %s1065_s23  ;;  %v609_v53 = vld [vmem:[%s1223_s1] sm:$0xff]  ;;  %vm624_vm4 = vcmask 1039360   ;;  %v1043_v57 = vld [vmem:[%s1223_s1 + $0x8] sm:$0xff]  ;;  %vm776_vm5 = vcmask 1031168   ;;  %s1066_s19 = smul.u32 12, %s1230_s22  ;;  %vm887_vm6 = vcmask 7168  }
   0xe   : > { %v275_v0 = vld [vmem:[%s259_s26 + $0x8] sm:$0xff]  ;;  %v274_v1 = vld [vmem:[%s259_s26] sm:$0xff] }
   0xf   : > { %v277_v2 = vmax.f32 %v275_v0, 0.0  ;;  %v276_v3 = vmax.f32 %v274_v1, 0.0  ;;  %v1056_v1 = vld [vmem:[%s1223_s1 + $0x10] sm:$0xff]  ;;  %s264_s26 = scalar_lea.vmem %s1226_s4, %s1066_s19 }
  0x11   : > { %285 = vst [vmem:[#allocation1 + $0x10] ss:$2 sm:$0xff] %v277_v2 }
  0x12   : > { %283 = vst [vmem:[#allocation1] ss:$2 sm:$0xff] %v276_v3 }
  0x18   : > { %v288_v4 = vld.sshfl [vmem:[#allocation1 + $0x10] sm:$0xff pattern:$0x75316420]  ;;  %v289_v5 = vld.sshfl [vmem:[#allocation1 + $0x18] sm:$0xff pattern:$0x75316420] }
  0x19   : > { %294 = vrot.lane.b32.xlu0 %v288_v4, %s1087_s27  ;;  %v286_v6 = vld.sshfl [vmem:[#allocation1] sm:$0xff pattern:$0x75316420]  ;;  %397 = vst [vmem:[#allocation1 + $0x10] ss:$2 sm:$0xff] %v277_v2 }
  0x1a   : > { %290 = vrot.lane.b32.xlu1 %v286_v6, %s1087_s27  ;;  %v287_v7 = vld.sshfl [vmem:[#allocation1 + $0x8] sm:$0xff pattern:$0x75316420] }
  0x1b   : > { %395 = vst [vmem:[#allocation1] ss:$2 sm:$0xff] %v276_v3 }
  0x20   : > { %v400_v8 = vld.sshfl [vmem:[#allocation1 + $0x10] sm:$0xff pattern:$0x75316420]  ;;  %v401_v9 = vld.sshfl [vmem:[#allocation1 + $0x18] sm:$0xff pattern:$0x75316420] }
  0x21   : > { %296 = vrot.lane.b32.xlu0 %v289_v5, %s1087_s27  ;;  %497 = vst [vmem:[#allocation1 + $0x10] ss:$2 sm:$0xff] %v277_v2 }
  0x22   : > { %292 = vrot.lane.b32.xlu1 %v287_v7, %s1087_s27  ;;  %v398_v10 = vld.sshfl [vmem:[#allocation1] sm:$0xff pattern:$0x75316420]  ;;  %v399_v11 = vld.sshfl [vmem:[#allocation1 + $0x8] sm:$0xff pattern:$0x75316420] }
  0x23   : > { %495 = vst [vmem:[#allocation1] ss:$2 sm:$0xff] %v276_v3  ;;  %s1015_s27 = sshll.u32 %s1230_s22, 3 }
  0x24   : > { %s268_s30 = scalar_lea.vmem %s1227_s5, %s1015_s27  ;;  %s272_s8 = scalar_lea.vmem %s1228_s6, %s1015_s27 }
  0x28   : > { %v500_v12 = vld.sshfl [vmem:[#allocation1 + $0x10] sm:$0xff pattern:$0x75316420]  ;;  %v501_v15 = vld.sshfl [vmem:[#allocation1 + $0x18] sm:$0xff pattern:$0x75316420] }
  0x29   : > { %506 = vrot.lane.b32.xlu2 %v500_v12, %s1088_s28 }
  0x2a   : > { %v499_v13 = vld.sshfl [vmem:[#allocation1 + $0x8] sm:$0xff pattern:$0x75316420]  ;;  %v498_v14 = vld.sshfl [vmem:[#allocation1] sm:$0xff pattern:$0x75316420] }
  0x2b   : > { %504 = vrot.lane.b32.xlu1 %v499_v13, %s1088_s28  ;;  %502 = vrot.lane.b32.xlu0 %v498_v14, %s1088_s28  ;;  %v273_v14 = vld [vmem:[%s1224_s2] sm:$0x7] }
  0x31   : > { %508 = vrot.lane.b32.xlu2 %v501_v15, %s1088_s28 }
  0x83   : > { %v507_v16 = vpop.permute.xlu2 %506 }
  0x8b   : > { %v295_v17 = vpop.permute.xlu0 %294  ;;  %v509_v23 = vpop.permute.xlu2 %508 }
  0x8c   : > { %v291_v18 = vpop.permute.xlu1 %290  ;;  %v513_v26 = vsel %vm510_vm3, %v507_v16, %v509_v23 }
  0x93   : > { %v297_v19 = vpop.permute.xlu0 %296 }
  0x94   : > { %v293_v20 = vpop.permute.xlu1 %292  ;;  %1024 = vmatpush.msk.msra.mxu3 %vm306_vm0, %v297_v19  ;;  %v301_v21 = vsel %vm298_vm1, %v295_v17, %v297_v19  ;;  %v858_v19 = vperm.slane %v273_v14, 1 }
  0x95   : > { %v299_v24 = vsel %vm298_vm1, %v291_v18, %v293_v20  ;;  %v300_v25 = vsel %vm298_vm1, %v293_v20, %v295_v17  ;;  %1022 = vmatpush.msk.msra.mxu2 %vm306_vm0, %v301_v21  ;;  %1025 = vmatmul.msk.f32.vlgmr.msra.gmra.mxu3 %vm302_vm2, %v1017_v22  ;;  %v857_v18 = vperm.slane %v273_v14, 0 }
  0x96   : > { %1018 = vmatpush.msk.msra.mxu0 %vm306_vm0, %v299_v24  ;;  %1020 = vmatpush.msk.msra.mxu1 %vm306_vm0, %v300_v25  ;;  %v859_v25 = vperm.slane %v273_v14, 2 }
  0x97   : > { %1019 = vmatmul.msk.f32.vlgmr.msra.gmra.mxu0 %vm302_vm2, %v1017_v22  ;;  %1021 = vmatmul.msk.f32.vlgmr.msra.gmra.mxu1 %vm302_vm2, %v1017_v22 }
  0x98   : > { %1023 = vmatmul.msk.f32.vlgmr.msra.gmra.mxu2 %vm302_vm2, %v1017_v22  ;;  %1028 = vmatpush.msk.msrb.mxu1 %vm306_vm0, %v399_v11 }
  0x99   : > { %1030 = vmatpush.msk.msrb.mxu2 %vm306_vm0, %v400_v8  ;;  %1026 = vmatpush.msk.msrb.mxu0 %vm306_vm0, %v398_v10 }
  0x9a   : > { %1032 = vmatpush.msk.msrb.mxu3 %vm306_vm0, %v401_v9 }
  0x9b   : > { %1039 = vmatpush.msk.msra.mxu2 %vm306_vm0, %v513_v26 }
  0x9c   : > { %1041 = vmatpush.msk.msra.mxu3 %vm306_vm0, %v509_v23 }
  0x9d   : > { %v505_v28 = vpop.permute.xlu1 %504  ;;  %1033 = vmatmul.msk.f32.vlgmr.msrb.gmra.mxu3 %vm302_vm2, %v278_v27  ;;  %v503_v29 = vpop.permute.xlu0 %502 }
  0x9e   : > { %v512_v30 = vsel %vm510_vm3, %v505_v28, %v507_v16  ;;  %v511_v31 = vsel %vm510_vm3, %v503_v29, %v505_v28 }
  0x9f   : > { %1037 = vmatpush.msk.msra.mxu1 %vm306_vm0, %v512_v30  ;;  %1027 = vmatmul.msk.f32.vlgmr.msrb.gmra.mxu0 %vm302_vm2, %v278_v27 }
  0xa0   : > { %1029 = vmatmul.msk.f32.vlgmr.msrb.gmra.mxu1 %vm302_vm2, %v278_v27  ;;  %1031 = vmatmul.msk.f32.vlgmr.msrb.gmra.mxu2 %vm302_vm2, %v278_v27 }
  0xa1   : > { %1035 = vmatpush.msk.msra.mxu0 %vm306_vm0, %v511_v31 }
  0xa5   : > { %1042 = vmatmul.msk.f32.vlgmr.msra.gmra.mxu3 %vm302_vm2, %v1034_v32 }
  0xa7   : > { %1036 = vmatmul.msk.f32.vlgmr.msra.gmra.mxu0 %vm302_vm2, %v1034_v32 }
  0xa8   : > { %1038 = vmatmul.msk.f32.vlgmr.msra.gmra.mxu1 %vm302_vm2, %v1034_v32  ;;  %1040 = vmatmul.msk.f32.vlgmr.msra.gmra.mxu2 %vm302_vm2, %v1034_v32 }
 0x114   : > { %v332_v33 = vpop.f32.mrf.mxu0  ;;  %v352_v34 = vpop.f32.mrf.mxu1 }
 0x118   : > { %v392_v35 = vpop.f32.mrf.mxu3 }
 0x11b   : > { %v372_v36 = vpop.f32.mrf.mxu2 }
 0x11c   : > { %v430_v37 = vpop.f32.mrf.mxu0 }
 0x11d   : > { %v450_v38 = vpop.f32.mrf.mxu1  ;;  %v431_v40 = vadd.f32 %v430_v37, %v332_v33 }
 0x11e   : > { %v451_v42 = vadd.f32 %v450_v38, %v352_v34 }
 0x120   : > { %v490_v39 = vpop.f32.mrf.mxu3 }
 0x121   : > { %v491_v47 = vadd.f32 %v490_v39, %v392_v35 }
 0x123   : > { %v470_v41 = vpop.f32.mrf.mxu2 }
 0x124   : > { %v542_v43 = vpop.f32.mrf.mxu0  ;;  %v471_v49 = vadd.f32 %v470_v41, %v372_v36 }
 0x125   : > { %v605_v44 = vadd.f32 %v542_v43, %v431_v40  ;;  %v562_v45 = vpop.f32.mrf.mxu1 }
 0x126   : > { %v606_v46 = vadd.f32 %v562_v45, %v451_v42 }
 0x127   : > { %616 = vrot.lane.b32.xlu2 %v605_v44, %s1089_s11  ;;  %1050 = vmatpush.msk.msrb.mxu3 %vm306_vm0, %v605_v44 }
 0x128   : > { %618 = vrot.lane.b32.xlu0 %v606_v46, %s1089_s11  ;;  %v602_v48 = vpop.f32.mrf.mxu3  ;;  %1051 = vmatmul.msk.f32.vlgmr.msrb.gmra.mxu3 %vm302_vm2, %v609_v53 }
 0x129   : > { %v608_v51 = vadd.f32 %v602_v48, %v491_v47 }
 0x12b   : > { %v582_v50 = vpop.f32.mrf.mxu2 }
 0x12c   : > { %v607_v52 = vadd.f32 %v582_v50, %v471_v49 }
 0x12e   : > { %620 = vrot.lane.b32.xlu1 %v607_v52, %s1089_s11 }
 0x12f   : > { %622 = vrot.lane.b32.xlu2 %v608_v51, %s1089_s11 }
 0x130   : > { %768 = vrot.lane.b32.xlu0 %v605_v44, %s1090_s12 }
 0x136   : > { %770 = vrot.lane.b32.xlu1 %v606_v46, %s1090_s12 }
 0x137   : > { %772 = vrot.lane.b32.xlu2 %v607_v52, %s1090_s12 }
 0x138   : > { %774 = vrot.lane.b32.xlu0 %v608_v51, %s1090_s12 }
 0x181   : > { %v617_v54 = vpop.permute.xlu2 %616 }
 0x189   : > { %v623_v58 = vpop.permute.xlu2 %622 }
 0x191   : > { %v773_v63 = vpop.permute.xlu2 %772 }
 0x19a   : > { %v619_v55 = vpop.permute.xlu0 %618 }
 0x19b   : > { %v625_v56 = vsel %vm624_vm4, %v617_v54, %v619_v55 }
 0x19c   : > { %1044 = vmatpush.msk.msrb.mxu0 %vm306_vm0, %v625_v56 }
 0x19d   : > { %1045 = vmatmul.msk.f32.vlgmr.msrb.gmra.mxu0 %vm302_vm2, %v1043_v57 }
 0x19e   : > { %1052 = vmatpush.msk.msra.mxu0 %vm306_vm0, %v606_v46 }
 0x1a0   : > { %v621_v59 = vpop.permute.xlu1 %620 }
 0x1a1   : > { %v626_v60 = vsel %vm624_vm4, %v619_v55, %v621_v59  ;;  %v627_v61 = vsel %vm624_vm4, %v621_v59, %v623_v58 }
 0x1a2   : > { %1046 = vmatpush.msk.msrb.mxu1 %vm306_vm0, %v626_v60  ;;  %v769_v62 = vpop.permute.xlu0 %768  ;;  %1048 = vmatpush.msk.msrb.mxu2 %vm306_vm0, %v627_v61 }
 0x1a3   : > { %1049 = vmatmul.msk.f32.vlgmr.msrb.gmra.mxu2 %vm302_vm2, %v1043_v57  ;;  %1047 = vmatmul.msk.f32.vlgmr.msrb.gmra.mxu1 %vm302_vm2, %v1043_v57 }
 0x1a4   : > { %1054 = vmatpush.msk.msra.mxu1 %vm306_vm0, %v607_v52 }
 0x1a5   : > { %1053 = vmatmul.msk.f32.vlgmr.msra.gmra.mxu0 %vm302_vm2, %v609_v53 }
 0x1a8   : > { %v771_v0 = vpop.permute.xlu1 %770 }
 0x1a9   : > { %v777_v2 = vsel %vm776_vm5, %v769_v62, %v771_v0  ;;  %v778_v3 = vsel %vm776_vm5, %v771_v0, %v773_v63 }
 0x1aa   : > { %v775_v4 = vpop.permute.xlu0 %774  ;;  %1057 = vmatpush.msk.msra.mxu2 %vm306_vm0, %v777_v2  ;;  %1059 = vmatpush.msk.msra.mxu3 %vm306_vm0, %v778_v3 }
 0x1ab   : > { %v779_v5 = vsel %vm776_vm5, %v773_v63, %v775_v4  ;;  %1058 = vmatmul.msk.f32.vlgmr.msra.gmra.mxu2 %vm302_vm2, %v1056_v1  ;;  %1060 = vmatmul.msk.f32.vlgmr.msra.gmra.mxu3 %vm302_vm2, %v1056_v1  ;;  %v723_v10 = vpop.f32.mrf.mxu3 }
 0x1ac   : > { %1061 = vmatpush.msk.msrb.mxu0 %vm306_vm0, %v779_v5  ;;  %1055 = vmatmul.msk.f32.vlgmr.msra.gmra.mxu1 %vm302_vm2, %v609_v53 }
 0x1ad   : > { %1062 = vmatmul.msk.f32.vlgmr.msrb.gmra.mxu0 %vm302_vm2, %v1056_v1 }
 0x21a   : > { %v654_v6 = vpop.f32.mrf.mxu0 }
 0x21b   : > { %v724_v16 = vadd.f32 %v723_v10, %v654_v6 }
 0x220   : > { %v674_v7 = vpop.f32.mrf.mxu1 }
 0x222   : > { %v743_v8 = vpop.f32.mrf.mxu0 }
 0x223   : > { %v744_v17 = vadd.f32 %v743_v8, %v674_v7 }
 0x226   : > { %v694_v9 = vpop.f32.mrf.mxu2 }
 0x229   : > { %v763_v11 = vpop.f32.mrf.mxu1 }
 0x22a   : > { %v764_v12 = vadd.f32 %v763_v11, %v694_v9  ;;  %v846_v13 = vpop.f32.mrf.mxu0 }
 0x22c   : > { %v851_v15 = vadd.f32 %v846_v13, %v764_v12 }
 0x22e   : > { %v806_v20 = vpop.f32.mrf.mxu2  ;;  %v826_v21 = vpop.f32.mrf.mxu3  ;;  %v853_v22 = vpack.c.bf16 %v851_v15, %v851_v15  ;;  %v865_v29 = vmul.f32 %v859_v25, %v851_v15 }
 0x22f   : > { %v849_v23 = vadd.f32 %v806_v20, %v724_v16  ;;  %v850_v24 = vadd.f32 %v826_v21, %v744_v17 }
 0x230   : > { %855 = vst [vmem:[%s264_s26 + $0x8] sm:$0xf] %v853_v22 }
 0x231   : > { %v863_v26 = vmul.f32 %v857_v18, %v849_v23  ;;  %v852_v27 = vpack.c.bf16 %v850_v24, %v849_v23  ;;  %v864_v28 = vmul.f32 %v858_v19, %v850_v24 }
 0x233   : > { %854 = vst [vmem:[%s264_s26] sm:$0xff] %v852_v27  ;;  %v866_v30 = vadd.f32 %v864_v28, %v863_v26 }
 0x235   : > { %v867_v31 = vadd.f32 %v866_v30, %v865_v29 }
 0x237   : > { %868 = vadd.xlane.f32.xlu1 %v867_v31 }
 0x2aa   : > { %v869_v32 = vpop.xlane.xlu1 %868 }
 0x2ab   : > { %v870_v33 = vmul.f32 0.0030864198, %v869_v32  ;;  %888 = vst.msk [vmem:[%s268_s30] sm:$0xff] %vm887_vm6, %v869_v32 }
 0x2ad   : > { %v871_v34 = vsub.f32 %v849_v23, %v870_v33  ;;  %v872_v35 = vsub.f32 %v850_v24, %v870_v33  ;;  %v873_v36 = vsub.f32 %v851_v15, %v870_v33  ;;  %v884_v45 = vmul.f32 %v870_v33, %v870_v33 }
 0x2af   : > { %v874_v37 = vmul.f32 %v871_v34, %v857_v18  ;;  %v875_v38 = vmul.f32 %v872_v35, %v858_v19  ;;  %v876_v39 = vmul.f32 %v873_v36, %v859_v25  ;;  %v885_v46 = vmul.f32 36.0, %v884_v45 }
 0x2b1   : > { %v877_v40 = vmul.f32 %v874_v37, %v874_v37  ;;  %v878_v41 = vmul.f32 %v875_v38, %v875_v38  ;;  %v879_v42 = vmul.f32 %v876_v39, %v876_v39 }
 0x2b3   : > { %v880_v43 = vadd.f32 %v878_v41, %v877_v40 }
 0x2b5   : > { %v881_v44 = vadd.f32 %v880_v43, %v879_v42 }
 0x2b7   : > { %882 = vadd.xlane.f32.xlu2 %v881_v44 }
 0x32a   : > { %v883_v47 = vpop.xlane.xlu2 %882 }
 0x32b   : > { %v886_v48 = vadd.f32 %v885_v46, %v883_v47 }
 0x32d   : > { %889 = vst.msk [vmem:[%s272_s8] sm:$0xff] %vm887_vm6, %v886_v48 }
 0x32e PF: > { %s17_s21 = sadd.s32 1, %s1085_s21  }
 0x32f   : > { %p14_p4 = scmp.ge.s32.totalorder %s17_s21, 4  }
 0x331   :  { %16 = sbr.rel (!%p14_p4) target bundleno = 1 (0x1), region = 97 }

</bundles_post_ra>
